<compile_context>
chip_gen: v6e
topology: v6e:2x2x1
jax: 0.10.0
libtpu: 0.0.40
codegen_flags: <defaults>
</compile_context>

<pallas_src>
import jax
import jax.numpy as jnp
import numpy as np
from jax.experimental import pallas as pl
from jax.experimental.pallas import tpu as pltpu


def convkb_kernel(x_ref, fwt_ref, cw_ref, cb_ref, fb_ref, o_ref):
    # x_ref  : (tb, L*D)  VMEM  flattened input tile (lane-dense)
    # fwt_ref: (D, O)     VMEM  fc weight transposed (column o = fc weights of channel o)
    # cw_ref : (O, L)     SMEM  conv weight scalars
    # cb_ref : (1, O)     SMEM  conv bias scalars
    # fb_ref : (1, 1)     SMEM  fc bias scalar
    # o_ref  : (tb, 1)          per-tile output column
    D, O = fwt_ref.shape
    L = cw_ref.shape[1]
    cdt = fwt_ref.dtype  # compute dtype of the VALU chain (bf16 iff x is bf16)

    # Load the L lane-aligned, D-wide slabs of x once.
    xs = [x_ref[:, l * D:(l + 1) * D].astype(cdt) for l in range(L)]
    tb = xs[0].shape[0]

    # Two independent accumulators (even / odd o) -> shorter dependency chain.
    acc0 = jnp.zeros((tb, 1), jnp.float32)
    acc1 = jnp.zeros((tb, 1), jnp.float32)

    # Fused conv + ReLU + FC, fully unrolled over the tiny O and L.
    #   h_o[b, :] = relu(sum_l x[b, l, :] * cw[o, l] + cb[o])   (scalar splats, VPU)
    #   out[b]   += h_o[b, :] @ fwT[:, o]                        (D-contraction, MXU)
    # TODO(synk): training-mode dropout not implemented (inference semantics).
    for o in range(O):
        h = xs[0] * cw_ref[o, 0].astype(cdt)
        for l in range(1, L):
            h = h + xs[l] * cw_ref[o, l].astype(cdt)
        h = jnp.maximum(h + cb_ref[0, o].astype(cdt), 0.0)
        mv = jax.lax.dot_general(
            h, fwt_ref[:, o:o + 1],
            dimension_numbers=(((1,), (0,)), ((), ())),
            preferred_element_type=jnp.float32,
        )  # (tb, 1) — natural lane contraction, no transpose of the accumulator
        if o & 1:
            acc1 = acc1 + mv
        else:
            acc0 = acc0 + mv

    out = acc0 + acc1 + fb_ref[0, 0]
    o_ref[...] = out.astype(o_ref.dtype)


def _pick_tb(B):
    """Tile size: multiple of 8 (128 for large B); >= 2 tiles whenever possible."""
    if B >= 1024:
        return 256                      # multiple of 128, >=4 tiles, near roofline
    if B >= 256:
        return 128
    half = (B + 1) // 2                 # small batch: aim for exactly 2 tiles
    return max(8, ((half + 7) // 8) * 8)


def convkb_forward(x, conv_w, conv_b, fc_w, fc_b, *, tb=None, input_buffers=None):
    """x: (B, L, D) f32/bf16; conv_w: (O,1,1,L); conv_b: (O,); fc_w: (1,O*D); fc_b: (1,).

    Returns (B, 1) float32, matching the PyTorch module in eval mode.
    """
    B, L, D = x.shape
    O = conv_w.shape[0]

    if tb is None:
        tb = _pick_tb(B)
    n_tiles = (B + tb - 1) // tb
    Bp = n_tiles * tb                   # pad-and-slice instead of asserting B % tb == 0

    # Flattened, lane-dense input layout; row-major reshape is free.
    x2d = x.reshape(B, L * D)
    if Bp != B:
        x2d = jnp.pad(x2d, ((0, Bp - B), (0, 0)))

    # bf16 inputs keep the VALU chain in bf16 (v6e/v7x native VPU); f32 stays f32.
    cdt = jnp.bfloat16 if x.dtype == jnp.bfloat16 else jnp.float32

    cw = conv_w.reshape(O, L).astype(jnp.float32)       # SMEM scalars
    cb = conv_b.reshape(1, O).astype(jnp.float32)       # SMEM scalars
    fwt = fc_w.reshape(O, D).T.astype(cdt)              # (D, O): o-major .view(B,-1) order
    fb = fc_b.reshape(1, 1).astype(jnp.float32)         # SMEM scalar

    # Optional deeper input buffering on v5e (DMA ~ VALU time there).
    if input_buffers is None:
        try:
            kind = jax.devices()[0].device_kind.lower()
            input_buffers = 3 if ("v5" in kind and ("lite" in kind or "v5e" in kind)) else 2
        except Exception:
            input_buffers = 2
    x_index = lambda i: (i, 0)
    if input_buffers > 2 and n_tiles >= input_buffers:
        x_spec = pl.BlockSpec((tb, L * D), x_index, pipeline_mode=pl.Buffered(input_buffers))
    else:
        x_spec = pl.BlockSpec((tb, L * D), x_index)

    # VMEM estimate: buffered x tiles + live working slabs (xs, h, accumulators).
    # Only raise the scoped limit when needed; cap well below v7x's 64 MiB.
    cdt_bytes = jnp.dtype(cdt).itemsize
    est = tb * (input_buffers * L * D * x2d.dtype.itemsize   # pipelined x tiles
                + (L + 2) * D * cdt_bytes                    # xs slabs + h
                + 16)                                        # accumulators + output
    est += 2 * (1 << 20)                                     # Mosaic internal scratch
    vmem_limit = int(min(est, 48 * 1024 * 1024)) if est > 12 * (1 << 20) else None

    out = pl.pallas_call(
        convkb_kernel,
        out_shape=jax.ShapeDtypeStruct((Bp, 1), jnp.float32),
        grid_spec=pltpu.PrefetchScalarGridSpec(
            num_scalar_prefetch=0,
            grid=(n_tiles,),
            in_specs=[
                x_spec,                                               # x tile (VMEM)
                pl.BlockSpec((D, O), lambda i: (0, 0)),               # fc weight^T (VMEM)
                pl.BlockSpec(memory_space=pltpu.MemorySpace.SMEM),    # conv weight
                pl.BlockSpec(memory_space=pltpu.MemorySpace.SMEM),    # conv bias
                pl.BlockSpec(memory_space=pltpu.MemorySpace.SMEM),    # fc bias
            ],
            out_specs=pl.BlockSpec((tb, 1), lambda i: (i, 0)),
        ),
        compiler_params=pltpu.CompilerParams(
            dimension_semantics=("parallel",),
            vmem_limit_bytes=vmem_limit,
        ),
    )(x2d, fwt, cw, cb, fb)

    return out[:B]


def ref_forward(x, conv_w, conv_b, fc_w, fc_b):
    """Pure-JAX reference mirroring the PyTorch forward (eval mode)."""
    B, L, D = x.shape
    O = conv_w.shape[0]
    conv = jnp.einsum('bld,ol->bod', x.astype(jnp.float32),
                      conv_w.reshape(O, L)) + conv_b[None, :, None]
    h = jnp.maximum(conv, 0.0)
    flat = h.reshape(B, -1)                            # (B, O*D), o-major
    return flat @ fc_w.T + fc_b[None, :]               # (B, 1)


def xavier_uniform(key, shape, fan_in, fan_out, gain):
    bound = gain * np.sqrt(6.0 / (fan_in + fan_out))
    return jax.random.uniform(key, shape, jnp.float32, -bound, bound)


if __name__ == "__main__":
    # Module hyperparameters: input_dim=128, input_seq_len=3, in_channels=1,
    # out_channels=8 (small shapes consistent with the forward pass).
    B, L, D, O = 16, 3, 128, 8
    gain = 1.414

    key = jax.random.PRNGKey(0)
    kx, kcw, kcb, kfw, kfb = jax.random.split(key, 5)

    x = jax.random.normal(kx, (B, L, D), jnp.float32)

    # Conv2d(1, O, (1, L)) weight: (O, 1, 1, L); xavier fan_in=L, fan_out=O*L.
    conv_w = xavier_uniform(kcw, (O, 1, 1, L), fan_in=L, fan_out=O * L, gain=gain)
    conv_b = jax.random.uniform(kcb, (O,), jnp.float32,
                                -1.0 / np.sqrt(L), 1.0 / np.sqrt(L))

    # Linear(D*O, 1) weight: (1, D*O); xavier fan_in=D*O, fan_out=1.
    fc_w = xavier_uniform(kfw, (1, O * D), fan_in=O * D, fan_out=1, gain=gain)
    fc_b = jax.random.uniform(kfb, (1,), jnp.float32,
                              -1.0 / np.sqrt(O * D), 1.0 / np.sqrt(O * D))

    out = jax.block_until_ready(convkb_forward(x, conv_w, conv_b, fc_w, fc_b))
    ref = jax.block_until_ready(ref_forward(x, conv_w, conv_b, fc_w, fc_b))
    np.testing.assert_allclose(np.asarray(out), np.asarray(ref), rtol=1e-5, atol=1e-5)

    print("KERNEL_OK")
</pallas_src>

<mosaic_0001>
module attributes {stable_mosaic.version = 11 : i64} {
  func.func @convkb_kernel(%arg0: i32, %arg1: memref<8x384xf32, #tpu.memory_space<vmem>>, %arg2: memref<128x8xf32, #tpu.memory_space<vmem>>, %arg3: memref<8x3xf32, #tpu.memory_space<smem>>, %arg4: memref<1x8xf32, #tpu.memory_space<smem>>, %arg5: memref<1x1xf32, #tpu.memory_space<smem>>, %arg6: memref<8x1xf32, #tpu.memory_space<vmem>>) attributes {dimension_semantics = [#tpu.dimension_semantics<parallel>], iteration_bounds = array<i64: 2>, scalar_prefetch = 0 : i64, scratch_operands = 0 : i64, tpu.core_type = #tpu.core_type<tc>, window_params = [{transform_indices = @transform_0, window_bounds = array<i64: 8, 384>}, {pipeline_mode = #tpu.pipeline_mode<synchronous>, transform_indices = @transform_1, window_bounds = array<i64: 128, 8>}, {transform_indices = @transform_2, window_bounds = array<i64: 8, 3>}, {transform_indices = @transform_3, window_bounds = array<i64: 1, 8>}, {transform_indices = @transform_4, window_bounds = array<i64: 1, 1>}, {transform_indices = @transform_5, window_bounds = array<i64: 8, 1>}]} {
    %c0 = arith.constant 0 : index
    %c0_0 = arith.constant 0 : index
    %0 = vector.load %arg1[%c0, %c0_0] : memref<8x384xf32, #tpu.memory_space<vmem>>, vector<8x128xf32>
    %c0_1 = arith.constant 0 : index
    %c128 = arith.constant 128 : index
    %1 = vector.load %arg1[%c0_1, %c128] : memref<8x384xf32, #tpu.memory_space<vmem>>, vector<8x128xf32>
    %c0_2 = arith.constant 0 : index
    %c256 = arith.constant 256 : index
    %2 = vector.load %arg1[%c0_2, %c256] : memref<8x384xf32, #tpu.memory_space<vmem>>, vector<8x128xf32>
    %cst = arith.constant 0.000000e+00 : f32
    %3 = vector.broadcast %cst : f32 to vector<8x1xf32>
    %cst_3 = arith.constant 0.000000e+00 : f32
    %4 = vector.broadcast %cst_3 : f32 to vector<8x1xf32>
    %c0_4 = arith.constant 0 : index
    %c0_5 = arith.constant 0 : index
    %5 = memref.load %arg3[%c0_4, %c0_5] : memref<8x3xf32, #tpu.memory_space<smem>>
    %6 = vector.broadcast %5 : f32 to vector<8x128xf32>
    %7 = arith.mulf %0, %6 : vector<8x128xf32>
    %c0_6 = arith.constant 0 : index
    %c1 = arith.constant 1 : index
    %8 = memref.load %arg3[%c0_6, %c1] : memref<8x3xf32, #tpu.memory_space<smem>>
    %9 = vector.broadcast %8 : f32 to vector<8x128xf32>
    %10 = arith.mulf %1, %9 : vector<8x128xf32>
    %11 = arith.addf %7, %10 : vector<8x128xf32>
    %c0_7 = arith.constant 0 : index
    %c2 = arith.constant 2 : index
    %12 = memref.load %arg3[%c0_7, %c2] : memref<8x3xf32, #tpu.memory_space<smem>>
    %13 = vector.broadcast %12 : f32 to vector<8x128xf32>
    %14 = arith.mulf %2, %13 : vector<8x128xf32>
    %15 = arith.addf %11, %14 : vector<8x128xf32>
    %c0_8 = arith.constant 0 : index
    %c0_9 = arith.constant 0 : index
    %16 = memref.load %arg4[%c0_8, %c0_9] : memref<1x8xf32, #tpu.memory_space<smem>>
    %17 = vector.broadcast %16 : f32 to vector<8x128xf32>
    %18 = arith.addf %15, %17 : vector<8x128xf32>
    %cst_10 = arith.constant 0.000000e+00 : f32
    %19 = vector.broadcast %cst_10 : f32 to vector<8x128xf32>
    %20 = arith.maximumf %18, %19 : vector<8x128xf32>
    %c0_11 = arith.constant 0 : index
    %c0_12 = arith.constant 0 : index
    %21 = vector.load %arg2[%c0_11, %c0_12] : memref<128x8xf32, #tpu.memory_space<vmem>>, vector<128x1xf32>
    %cst_13 = arith.constant dense<0.000000e+00> : vector<8x1xf32>
    %22 = tpu.matmul %20, %21, %cst_13 {dimension_numbers = #tpu.dot_dimension_numbers<[1], [0], [0], [1], [0, 0, 1, 1], [], []>} : vector<8x128xf32>, vector<128x1xf32>, vector<8x1xf32> -> vector<8x1xf32>
    %23 = arith.addf %3, %22 : vector<8x1xf32>
    %c1_14 = arith.constant 1 : index
    %c0_15 = arith.constant 0 : index
    %24 = memref.load %arg3[%c1_14, %c0_15] : memref<8x3xf32, #tpu.memory_space<smem>>
    %25 = vector.broadcast %24 : f32 to vector<8x128xf32>
    %26 = arith.mulf %0, %25 : vector<8x128xf32>
    %c1_16 = arith.constant 1 : index
    %c1_17 = arith.constant 1 : index
    %27 = memref.load %arg3[%c1_16, %c1_17] : memref<8x3xf32, #tpu.memory_space<smem>>
    %28 = vector.broadcast %27 : f32 to vector<8x128xf32>
    %29 = arith.mulf %1, %28 : vector<8x128xf32>
    %30 = arith.addf %26, %29 : vector<8x128xf32>
    %c1_18 = arith.constant 1 : index
    %c2_19 = arith.constant 2 : index
    %31 = memref.load %arg3[%c1_18, %c2_19] : memref<8x3xf32, #tpu.memory_space<smem>>
    %32 = vector.broadcast %31 : f32 to vector<8x128xf32>
    %33 = arith.mulf %2, %32 : vector<8x128xf32>
    %34 = arith.addf %30, %33 : vector<8x128xf32>
    %c0_20 = arith.constant 0 : index
    %c1_21 = arith.constant 1 : index
    %35 = memref.load %arg4[%c0_20, %c1_21] : memref<1x8xf32, #tpu.memory_space<smem>>
    %36 = vector.broadcast %35 : f32 to vector<8x128xf32>
    %37 = arith.addf %34, %36 : vector<8x128xf32>
    %cst_22 = arith.constant 0.000000e+00 : f32
    %38 = vector.broadcast %cst_22 : f32 to vector<8x128xf32>
    %39 = arith.maximumf %37, %38 : vector<8x128xf32>
    %c0_23 = arith.constant 0 : index
    %c1_24 = arith.constant 1 : index
    %40 = vector.load %arg2[%c0_23, %c1_24] : memref<128x8xf32, #tpu.memory_space<vmem>>, vector<128x1xf32>
    %cst_25 = arith.constant dense<0.000000e+00> : vector<8x1xf32>
    %41 = tpu.matmul %39, %40, %cst_25 {dimension_numbers = #tpu.dot_dimension_numbers<[1], [0], [0], [1], [0, 0, 1, 1], [], []>} : vector<8x128xf32>, vector<128x1xf32>, vector<8x1xf32> -> vector<8x1xf32>
    %42 = arith.addf %4, %41 : vector<8x1xf32>
    %c2_26 = arith.constant 2 : index
    %c0_27 = arith.constant 0 : index
    %43 = memref.load %arg3[%c2_26, %c0_27] : memref<8x3xf32, #tpu.memory_space<smem>>
    %44 = vector.broadcast %43 : f32 to vector<8x128xf32>
    %45 = arith.mulf %0, %44 : vector<8x128xf32>
    %c2_28 = arith.constant 2 : index
    %c1_29 = arith.constant 1 : index
    %46 = memref.load %arg3[%c2_28, %c1_29] : memref<8x3xf32, #tpu.memory_space<smem>>
    %47 = vector.broadcast %46 : f32 to vector<8x128xf32>
    %48 = arith.mulf %1, %47 : vector<8x128xf32>
    %49 = arith.addf %45, %48 : vector<8x128xf32>
    %c2_30 = arith.constant 2 : index
    %c2_31 = arith.constant 2 : index
    %50 = memref.load %arg3[%c2_30, %c2_31] : memref<8x3xf32, #tpu.memory_space<smem>>
    %51 = vector.broadcast %50 : f32 to vector<8x128xf32>
    %52 = arith.mulf %2, %51 : vector<8x128xf32>
    %53 = arith.addf %49, %52 : vector<8x128xf32>
    %c0_32 = arith.constant 0 : index
    %c2_33 = arith.constant 2 : index
    %54 = memref.load %arg4[%c0_32, %c2_33] : memref<1x8xf32, #tpu.memory_space<smem>>
    %55 = vector.broadcast %54 : f32 to vector<8x128xf32>
    %56 = arith.addf %53, %55 : vector<8x128xf32>
    %cst_34 = arith.constant 0.000000e+00 : f32
    %57 = vector.broadcast %cst_34 : f32 to vector<8x128xf32>
    %58 = arith.maximumf %56, %57 : vector<8x128xf32>
    %c0_35 = arith.constant 0 : index
    %c2_36 = arith.constant 2 : index
    %59 = vector.load %arg2[%c0_35, %c2_36] : memref<128x8xf32, #tpu.memory_space<vmem>>, vector<128x1xf32>
    %cst_37 = arith.constant dense<0.000000e+00> : vector<8x1xf32>
    %60 = tpu.matmul %58, %59, %cst_37 {dimension_numbers = #tpu.dot_dimension_numbers<[1], [0], [0], [1], [0, 0, 1, 1], [], []>} : vector<8x128xf32>, vector<128x1xf32>, vector<8x1xf32> -> vector<8x1xf32>
    %61 = arith.addf %23, %60 : vector<8x1xf32>
    %c3 = arith.constant 3 : index
    %c0_38 = arith.constant 0 : index
    %62 = memref.load %arg3[%c3, %c0_38] : memref<8x3xf32, #tpu.memory_space<smem>>
    %63 = vector.broadcast %62 : f32 to vector<8x128xf32>
    %64 = arith.mulf %0, %63 : vector<8x128xf32>
    %c3_39 = arith.constant 3 : index
    %c1_40 = arith.constant 1 : index
    %65 = memref.load %arg3[%c3_39, %c1_40] : memref<8x3xf32, #tpu.memory_space<smem>>
    %66 = vector.broadcast %65 : f32 to vector<8x128xf32>
    %67 = arith.mulf %1, %66 : vector<8x128xf32>
    %68 = arith.addf %64, %67 : vector<8x128xf32>
    %c3_41 = arith.constant 3 : index
    %c2_42 = arith.constant 2 : index
    %69 = memref.load %arg3[%c3_41, %c2_42] : memref<8x3xf32, #tpu.memory_space<smem>>
    %70 = vector.broadcast %69 : f32 to vector<8x128xf32>
    %71 = arith.mulf %2, %70 : vector<8x128xf32>
    %72 = arith.addf %68, %71 : vector<8x128xf32>
    %c0_43 = arith.constant 0 : index
    %c3_44 = arith.constant 3 : index
    %73 = memref.load %arg4[%c0_43, %c3_44] : memref<1x8xf32, #tpu.memory_space<smem>>
    %74 = vector.broadcast %73 : f32 to vector<8x128xf32>
    %75 = arith.addf %72, %74 : vector<8x128xf32>
    %cst_45 = arith.constant 0.000000e+00 : f32
    %76 = vector.broadcast %cst_45 : f32 to vector<8x128xf32>
    %77 = arith.maximumf %75, %76 : vector<8x128xf32>
    %c0_46 = arith.constant 0 : index
    %c3_47 = arith.constant 3 : index
    %78 = vector.load %arg2[%c0_46, %c3_47] : memref<128x8xf32, #tpu.memory_space<vmem>>, vector<128x1xf32>
    %cst_48 = arith.constant dense<0.000000e+00> : vector<8x1xf32>
    %79 = tpu.matmul %77, %78, %cst_48 {dimension_numbers = #tpu.dot_dimension_numbers<[1], [0], [0], [1], [0, 0, 1, 1], [], []>} : vector<8x128xf32>, vector<128x1xf32>, vector<8x1xf32> -> vector<8x1xf32>
    %80 = arith.addf %42, %79 : vector<8x1xf32>
    %c4 = arith.constant 4 : index
    %c0_49 = arith.constant 0 : index
    %81 = memref.load %arg3[%c4, %c0_49] : memref<8x3xf32, #tpu.memory_space<smem>>
    %82 = vector.broadcast %81 : f32 to vector<8x128xf32>
    %83 = arith.mulf %0, %82 : vector<8x128xf32>
    %c4_50 = arith.constant 4 : index
    %c1_51 = arith.constant 1 : index
    %84 = memref.load %arg3[%c4_50, %c1_51] : memref<8x3xf32, #tpu.memory_space<smem>>
    %85 = vector.broadcast %84 : f32 to vector<8x128xf32>
    %86 = arith.mulf %1, %85 : vector<8x128xf32>
    %87 = arith.addf %83, %86 : vector<8x128xf32>
    %c4_52 = arith.constant 4 : index
    %c2_53 = arith.constant 2 : index
    %88 = memref.load %arg3[%c4_52, %c2_53] : memref<8x3xf32, #tpu.memory_space<smem>>
    %89 = vector.broadcast %88 : f32 to vector<8x128xf32>
    %90 = arith.mulf %2, %89 : vector<8x128xf32>
    %91 = arith.addf %87, %90 : vector<8x128xf32>
    %c0_54 = arith.constant 0 : index
    %c4_55 = arith.constant 4 : index
    %92 = memref.load %arg4[%c0_54, %c4_55] : memref<1x8xf32, #tpu.memory_space<smem>>
    %93 = vector.broadcast %92 : f32 to vector<8x128xf32>
    %94 = arith.addf %91, %93 : vector<8x128xf32>
    %cst_56 = arith.constant 0.000000e+00 : f32
    %95 = vector.broadcast %cst_56 : f32 to vector<8x128xf32>
    %96 = arith.maximumf %94, %95 : vector<8x128xf32>
    %c0_57 = arith.constant 0 : index
    %c4_58 = arith.constant 4 : index
    %97 = vector.load %arg2[%c0_57, %c4_58] : memref<128x8xf32, #tpu.memory_space<vmem>>, vector<128x1xf32>
    %cst_59 = arith.constant dense<0.000000e+00> : vector<8x1xf32>
    %98 = tpu.matmul %96, %97, %cst_59 {dimension_numbers = #tpu.dot_dimension_numbers<[1], [0], [0], [1], [0, 0, 1, 1], [], []>} : vector<8x128xf32>, vector<128x1xf32>, vector<8x1xf32> -> vector<8x1xf32>
    %99 = arith.addf %61, %98 : vector<8x1xf32>
    %c5 = arith.constant 5 : index
    %c0_60 = arith.constant 0 : index
    %100 = memref.load %arg3[%c5, %c0_60] : memref<8x3xf32, #tpu.memory_space<smem>>
    %101 = vector.broadcast %100 : f32 to vector<8x128xf32>
    %102 = arith.mulf %0, %101 : vector<8x128xf32>
    %c5_61 = arith.constant 5 : index
    %c1_62 = arith.constant 1 : index
    %103 = memref.load %arg3[%c5_61, %c1_62] : memref<8x3xf32, #tpu.memory_space<smem>>
    %104 = vector.broadcast %103 : f32 to vector<8x128xf32>
    %105 = arith.mulf %1, %104 : vector<8x128xf32>
    %106 = arith.addf %102, %105 : vector<8x128xf32>
    %c5_63 = arith.constant 5 : index
    %c2_64 = arith.constant 2 : index
    %107 = memref.load %arg3[%c5_63, %c2_64] : memref<8x3xf32, #tpu.memory_space<smem>>
    %108 = vector.broadcast %107 : f32 to vector<8x128xf32>
    %109 = arith.mulf %2, %108 : vector<8x128xf32>
    %110 = arith.addf %106, %109 : vector<8x128xf32>
    %c0_65 = arith.constant 0 : index
    %c5_66 = arith.constant 5 : index
    %111 = memref.load %arg4[%c0_65, %c5_66] : memref<1x8xf32, #tpu.memory_space<smem>>
    %112 = vector.broadcast %111 : f32 to vector<8x128xf32>
    %113 = arith.addf %110, %112 : vector<8x128xf32>
    %cst_67 = arith.constant 0.000000e+00 : f32
    %114 = vector.broadcast %cst_67 : f32 to vector<8x128xf32>
    %115 = arith.maximumf %113, %114 : vector<8x128xf32>
    %c0_68 = arith.constant 0 : index
    %c5_69 = arith.constant 5 : index
    %116 = vector.load %arg2[%c0_68, %c5_69] : memref<128x8xf32, #tpu.memory_space<vmem>>, vector<128x1xf32>
    %cst_70 = arith.constant dense<0.000000e+00> : vector<8x1xf32>
    %117 = tpu.matmul %115, %116, %cst_70 {dimension_numbers = #tpu.dot_dimension_numbers<[1], [0], [0], [1], [0, 0, 1, 1], [], []>} : vector<8x128xf32>, vector<128x1xf32>, vector<8x1xf32> -> vector<8x1xf32>
    %118 = arith.addf %80, %117 : vector<8x1xf32>
    %c6 = arith.constant 6 : index
    %c0_71 = arith.constant 0 : index
    %119 = memref.load %arg3[%c6, %c0_71] : memref<8x3xf32, #tpu.memory_space<smem>>
    %120 = vector.broadcast %119 : f32 to vector<8x128xf32>
    %121 = arith.mulf %0, %120 : vector<8x128xf32>
    %c6_72 = arith.constant 6 : index
    %c1_73 = arith.constant 1 : index
    %122 = memref.load %arg3[%c6_72, %c1_73] : memref<8x3xf32, #tpu.memory_space<smem>>
    %123 = vector.broadcast %122 : f32 to vector<8x128xf32>
    %124 = arith.mulf %1, %123 : vector<8x128xf32>
    %125 = arith.addf %121, %124 : vector<8x128xf32>
    %c6_74 = arith.constant 6 : index
    %c2_75 = arith.constant 2 : index
    %126 = memref.load %arg3[%c6_74, %c2_75] : memref<8x3xf32, #tpu.memory_space<smem>>
    %127 = vector.broadcast %126 : f32 to vector<8x128xf32>
    %128 = arith.mulf %2, %127 : vector<8x128xf32>
    %129 = arith.addf %125, %128 : vector<8x128xf32>
    %c0_76 = arith.constant 0 : index
    %c6_77 = arith.constant 6 : index
    %130 = memref.load %arg4[%c0_76, %c6_77] : memref<1x8xf32, #tpu.memory_space<smem>>
    %131 = vector.broadcast %130 : f32 to vector<8x128xf32>
    %132 = arith.addf %129, %131 : vector<8x128xf32>
    %cst_78 = arith.constant 0.000000e+00 : f32
    %133 = vector.broadcast %cst_78 : f32 to vector<8x128xf32>
    %134 = arith.maximumf %132, %133 : vector<8x128xf32>
    %c0_79 = arith.constant 0 : index
    %c6_80 = arith.constant 6 : index
    %135 = vector.load %arg2[%c0_79, %c6_80] : memref<128x8xf32, #tpu.memory_space<vmem>>, vector<128x1xf32>
    %cst_81 = arith.constant dense<0.000000e+00> : vector<8x1xf32>
    %136 = tpu.matmul %134, %135, %cst_81 {dimension_numbers = #tpu.dot_dimension_numbers<[1], [0], [0], [1], [0, 0, 1, 1], [], []>} : vector<8x128xf32>, vector<128x1xf32>, vector<8x1xf32> -> vector<8x1xf32>
    %137 = arith.addf %99, %136 : vector<8x1xf32>
    %c7 = arith.constant 7 : index
    %c0_82 = arith.constant 0 : index
    %138 = memref.load %arg3[%c7, %c0_82] : memref<8x3xf32, #tpu.memory_space<smem>>
    %139 = vector.broadcast %138 : f32 to vector<8x128xf32>
    %140 = arith.mulf %0, %139 : vector<8x128xf32>
    %c7_83 = arith.constant 7 : index
    %c1_84 = arith.constant 1 : index
    %141 = memref.load %arg3[%c7_83, %c1_84] : memref<8x3xf32, #tpu.memory_space<smem>>
    %142 = vector.broadcast %141 : f32 to vector<8x128xf32>
    %143 = arith.mulf %1, %142 : vector<8x128xf32>
    %144 = arith.addf %140, %143 : vector<8x128xf32>
    %c7_85 = arith.constant 7 : index
    %c2_86 = arith.constant 2 : index
    %145 = memref.load %arg3[%c7_85, %c2_86] : memref<8x3xf32, #tpu.memory_space<smem>>
    %146 = vector.broadcast %145 : f32 to vector<8x128xf32>
    %147 = arith.mulf %2, %146 : vector<8x128xf32>
    %148 = arith.addf %144, %147 : vector<8x128xf32>
    %c0_87 = arith.constant 0 : index
    %c7_88 = arith.constant 7 : index
    %149 = memref.load %arg4[%c0_87, %c7_88] : memref<1x8xf32, #tpu.memory_space<smem>>
    %150 = vector.broadcast %149 : f32 to vector<8x128xf32>
    %151 = arith.addf %148, %150 : vector<8x128xf32>
    %cst_89 = arith.constant 0.000000e+00 : f32
    %152 = vector.broadcast %cst_89 : f32 to vector<8x128xf32>
    %153 = arith.maximumf %151, %152 : vector<8x128xf32>
    %c0_90 = arith.constant 0 : index
    %c7_91 = arith.constant 7 : index
    %154 = vector.load %arg2[%c0_90, %c7_91] : memref<128x8xf32, #tpu.memory_space<vmem>>, vector<128x1xf32>
    %cst_92 = arith.constant dense<0.000000e+00> : vector<8x1xf32>
    %155 = tpu.matmul %153, %154, %cst_92 {dimension_numbers = #tpu.dot_dimension_numbers<[1], [0], [0], [1], [0, 0, 1, 1], [], []>} : vector<8x128xf32>, vector<128x1xf32>, vector<8x1xf32> -> vector<8x1xf32>
    %156 = arith.addf %118, %155 : vector<8x1xf32>
    %157 = arith.addf %137, %156 : vector<8x1xf32>
    %c0_93 = arith.constant 0 : index
    %c0_94 = arith.constant 0 : index
    %158 = memref.load %arg5[%c0_93, %c0_94] : memref<1x1xf32, #tpu.memory_space<smem>>
    %159 = vector.broadcast %158 : f32 to vector<8x1xf32>
    %160 = arith.addf %157, %159 : vector<8x1xf32>
    %c0_95 = arith.constant 0 : index
    %c0_96 = arith.constant 0 : index
    %161 = vector.load %arg6[%c0_95, %c0_96] : memref<8x1xf32, #tpu.memory_space<vmem>>, vector<8x1xf32>
    tpu.vector_store %arg6[%c0_95, %c0_96], %160 {strides = array<i32>} : memref<8x1xf32, #tpu.memory_space<vmem>>, vector<8x1xf32>,
    return
  }
  func.func @transform_0(%arg0: i32) -> (i32, i32) {
    %c0_i32 = arith.constant 0 : i32
    %c0_i32_0 = arith.constant 0 : i32
    return %arg0, %c0_i32 : i32, i32
  }
  func.func @transform_1(%arg0: i32) -> (i32, i32) {
    %c0_i32 = arith.constant 0 : i32
    %c0_i32_0 = arith.constant 0 : i32
    %c0_i32_1 = arith.constant 0 : i32
    return %c0_i32, %c0_i32_0 : i32, i32
  }
  func.func @transform_2(%arg0: i32) -> (i32, i32) {
    %c0_i32 = arith.constant 0 : i32
    %c0_i32_0 = arith.constant 0 : i32
    %c0_i32_1 = arith.constant 0 : i32
    return %c0_i32, %c0_i32_0 : i32, i32
  }
  func.func @transform_3(%arg0: i32) -> (i32, i32) {
    %c0_i32 = arith.constant 0 : i32
    %c0_i32_0 = arith.constant 0 : i32
    %c0_i32_1 = arith.constant 0 : i32
    return %c0_i32, %c0_i32_0 : i32, i32
  }
  func.func @transform_4(%arg0: i32) -> (i32, i32) {
    %c0_i32 = arith.constant 0 : i32
    %c0_i32_0 = arith.constant 0 : i32
    %c0_i32_1 = arith.constant 0 : i32
    return %c0_i32, %c0_i32_0 : i32, i32
  }
  func.func @transform_5(%arg0: i32) -> (i32, i32) {
    %c0_i32 = arith.constant 0 : i32
    %c0_i32_0 = arith.constant 0 : i32
    return %arg0, %c0_i32 : i32, i32
  }
}

</mosaic_0001>

<bundles_post_ra>
// kernel: tpu_custom_call.1
= control target key start
LH: loop header
LB: loop body
LE: loop exit
PB: predicated region body
PF: predicated region fallthrough
CT: control target
= control target key end

     0   :  { %s2594_s0 = inlined_call_operand.vmem [shape: f32[16,384], index: 0, kind: input, shape index: {}]   ;;  %s2595_s1 = inlined_call_operand.vmem [shape: f32[128,8], index: 1, kind: input, shape index: {}]   ;;  %s2596_s2 = inlined_call_operand.vmem [shape: f32[8,3], index: 2, kind: input, shape index: {}]   ;;  %s2597_s3 = inlined_call_operand.vmem [shape: f32[1,8], index: 3, kind: input, shape index: {}]   ;;  %s2598_s4 = inlined_call_operand.<no memory space> [shape: f32[1,1], index: 4, kind: input, shape index: {}]   ;;  %s2599_s5 = inlined_call_operand.vmem [shape: f32[16,1], index: 5, kind: output, shape index: {}]  }
   0x1   :  { %10 = sst [smem:[#allocation2]] %s2598_s4 }
   0x2   :  { %11 = vsyncpa [#allocation4], 0 }
   0x3   :  { %12 = vsyncpa [#allocation6], 0  ;;  %s1978_s20 = smov 0  }
   0x4 LB: > { %s1984_s21 = sadd.s32 4294967295, %s1932_s20   ;;  %p1389_p0 = scmp.ge.s32.totalorder %s1932_s20, 1  ;;  %s1932_s20 = sphi %s1978_s20, %s18_s20  }
   0x5   : > { %p159_p1 = scmp.lt.s32.totalorder %s1932_s20, 3  ;;  %s175_s23 = sshll.u32 %s2596_s2, 4  ;;  %s176_s23 = int_to_ptr.vmem [resolvable:$true] %s175_s23 }
   0x6   : > { %p2600_p3 = scmp.eq.s32.totalorder %s1984_s21, 0  ;;  %s186_s27 = sshll.u32 %s2597_s3, 4  ;;  %s187_s27 = int_to_ptr.vmem [resolvable:$true] %s186_s27 }
   0x7   : > { %p1991_p2 = pnand %p1389_p0, %p159_p1  ;;  %s1888_s29 = scalar_lea.vmem %s176_s23, 128 }
   0x8   : > { %p1889_p6 = scmp.ne.s32.totalorder %s176_s23, %s1888_s29  ;;  %p1896_p10 = scmp.lt.s32.totalorder %s176_s23, %s176_s23 }
   0x9   : > { %s2602_s24 = scalar_select %p1991_p2, 1, 0 }
   0xa   : > { %p1855_p4 = pneg %p1991_p2  ;;  %p1897_p11 = scmp.lt.s32.totalorder %s1888_s29, %s1888_s29 }
   0xc   : > { %p2003_p5 = pnand %p2600_p3, %p1855_p4  ;;  %p1898_p12 = por %p1897_p11, %p1896_p10 }
   0xe   : > { %p1890_p7 = pneg %p2003_p5 }
  0x10   : > { %p1891_p8 = pnand %p1890_p7, %p1889_p6 }
  0x12   : > { %p1892_p9 = pneg %p1891_p8 }
  0x14   : > { %p1899_p13 = pnand %p1898_p12, %p1892_p9 }
  0x16   : > { %1902 = shalt.err (!%p1899_p13)
}
  0x17   : > { %s1934_s30 = smov [#allocation3]   ;;  %s1903_s6 = scalar_lea.vmem %s187_s27, 16 }
  0x18   : > { %1858 = dma.vmem_to_smem (!%p2003_p5), %s176_s23, 128, %s1934_s30, [#allocation4]  }
  0x19   : > { %p1904_p0 = scmp.ne.s32.totalorder %s187_s27, %s1903_s6  ;;  %p1911_p3 = scmp.lt.s32.totalorder %s187_s27, %s187_s27 }
  0x1a   : > { %p1912_p2 = scmp.lt.s32.totalorder %s1903_s6, %s1903_s6 }
  0x1b   : > { %p1906_p1 = pnand %p1904_p0, %p1890_p7 }
  0x1c   : > { %p1913_p6 = por %p1912_p2, %p1911_p3 }
  0x1d   : > { %p1907_p4 = pneg %p1906_p1 }
  0x1f   : > { %p1914_p8 = pnand %p1913_p6, %p1907_p4 }
  0x21   : > { %1917 = shalt.err (!%p1914_p8)
}
  0x22   : > { %s1935_s7 = smov [#allocation5]   ;;  %p2604_p9 = scmp.ne.s32.totalorder %s2602_s24, 0 }
  0x23   : > { %1861 = dma.vmem_to_smem (!%p2003_p5), %s187_s27, 16, %s1935_s7, [#allocation6]  }
  0x24   : > { %210 = sbr.rel (%p2604_p9) target bundleno = 586 (0x24a), region = 40  ;;  %p2605_p10 = scmp.eq.s32.totalorder (!%p2604_p9), %s1984_s21, 0 }
  0x29   : > { %1923 = dma.done.wait (%p2605_p10), [#allocation4], 128   ;;  %p2606_p11 = pmov %p2605_p10 }
  0x2a   : > { %p2607_p7 = pmov %p2605_p10 }
  0x2b   : > { %1925 = vsyncadd (%p2606_p11), [#allocation4], 4294967168 }
  0x2c   : > { %1927 = dma.done.wait (%p2607_p7), [#allocation6], 16   ;;  %p2608_p2 = pmov %p2607_p7 }
  0x2e   : > { %1929 = vsyncadd (%p2608_p2), [#allocation6], 4294967280 }
  0x2f   : > { %220 = sfence }
  0x30   : > { %v2026_v0 = vld [vmem:[%s2595_s1 + $0x78] sm:$0xff]  ;;  %v2031_v1 = vld [vmem:[%s2595_s1 + $0x68] sm:$0xff]  ;;  %s1936_s12 = smov 126   ;;  %v2040_v2 = vld [vmem:[%s2595_s1 + $0x70] sm:$0xff]  ;;  %v1937_v4 = vmov 0.0   ;;  %p242_p3 = scmp.lt.s32.totalorder %s1984_s21, 1 }
  0x31   : > { %361 = vrot.lane.b32.xlu0 %v2026_v0, %s1936_s12  ;;  %357 = vrot.lane.b32.xlu1 %v2031_v1, %s1936_s12  ;;  %v2045_v3 = vld [vmem:[%s2595_s1 + $0x60] sm:$0xff]  ;;  %v2059_v5 = vld [vmem:[%s2595_s1 + $0x58] sm:$0xff]  ;;  %s2089_s26 = sld [smem:[#allocation3]]  ;;  %vm1938_vm0 = vmmov 0   ;;  %s1942_s29 = smov 123   ;;  %vm1310_vm1 = vcmask 7168  }
  0x32   : > { %1566 = vmatprep.subr.mxu0 %v1937_v4  ;;  %1601 = vmatprep.subr.mxu1 %v1937_v4  ;;  %v2064_v6 = vld [vmem:[%s2595_s1 + $0x50] sm:$0xff]  ;;  %s2610_s21 = smov (!%p242_p3, %s1984_s21), 1  ;;  %v2079_v7 = vld [vmem:[%s2595_s1 + $0x48] sm:$0xff]  ;;  %v2084_v8 = vld [vmem:[%s2595_s1 + $0x40] sm:$0xff]  ;;  %s1398_s28 = sld [smem:[#allocation3 + $0x1]] }
  0x33   : > { %1602 = vmatpush3.msra.mxu1 %v2026_v0  ;;  %s1846_s27 = smul.u32 24, %s2610_s21  ;;  %v2099_v9 = vld [vmem:[%s2595_s1 + $0x38] sm:$0xff]  ;;  %v2104_v10 = vld [vmem:[%s2595_s1 + $0x30] sm:$0xff]  ;;  %s2118_s11 = sld [smem:[#allocation3 + $0x2]]  ;;  %v2123_v11 = vld [vmem:[%s2595_s1 + $0x28] sm:$0xff]  ;;  %1633 = vmatprep.mubr.msk.f32.mxu1 %vm1938_vm0, %v1937_v4 }
  0x34   : > { %1603 = vmatprep.subr.mxu1 %v1937_v4  ;;  %v2128_v12 = vld [vmem:[%s2595_s1 + $0x20] sm:$0xff]  ;;  %v2149_v17 = vld [vmem:[%s2595_s1 + $0x18] sm:$0xff]  ;;  %v2154_v18 = vld [vmem:[%s2595_s1 + $0x10] sm:$0xff]  ;;  %1598 = vmatprep.mubr.msk.f32.mxu0 %vm1938_vm0, %v1937_v4  ;;  %s265_s4 = sld [smem:[#allocation5]]  ;;  %s1943_s9 = smov 122  }
  0x35   : > { %359 = vrot.lane.b32.xlu0 %v2040_v2, %s1936_s12  ;;  %355 = vrot.lane.b32.xlu1 %v2045_v3, %s1936_s12  ;;  %s2116_s10 = scalar_lea.vmem %s2594_s0, %s1846_s27  ;;  %v2174_v23 = vld [vmem:[%s2595_s1 + $0x8] sm:$0xff]  ;;  %v2179_v24 = vld [vmem:[%s2595_s1] sm:$0xff]  ;;  %s1939_s27 = smov 125  }
  0x36   : > { %1604 = vmatpush3.msra.mxu1 %v2040_v2  ;;  %v2136_v13 = vld [vmem:[%s2116_s10] sm:$0xff]  ;;  %v2139_v14 = vld [vmem:[%s2116_s10 + $0x8] sm:$0xff]  ;;  %v2168_v21 = vld [vmem:[%s2116_s10 + $0x10] sm:$0xff]  ;;  %s1404_s30 = sld [smem:[#allocation3 + $0x100]] }
  0x37   : > { %1605 = vmatprep.subr.mxu1 %v1937_v4  ;;  %v255_v15 = vstv %s2089_s26  ;;  %s1405_s6 = sld [smem:[#allocation3 + $0x101]] }
  0x38   : > { %1606 = vmatpush3.msra.mxu1 %v2031_v1  ;;  %v258_v16 = vstv %s1398_s28  ;;  %v256_v19 = vmul.f32 %v255_v15, %v2136_v13  ;;  %s1940_s28 = smov 127   ;;  %s1406_s7 = sld [smem:[#allocation3 + $0x102]] }
  0x39   : > { %353 = vrot.lane.b32.xlu0 %v2059_v5, %s1936_s12  ;;  %351 = vrot.lane.b32.xlu1 %v2064_v6, %s1936_s12  ;;  %v259_v20 = vmul.f32 %v258_v16, %v2139_v14  ;;  %v262_v22 = vstv %s2118_s11  ;;  %s1407_s8 = sld [smem:[#allocation5 + $0x2]]  ;;  %s1944_s11 = smov 121  }
  0x3a   : > { %1607 = vmatprep.subr.mxu1 %v1937_v4  ;;  %v263_v26 = vmul.f32 %v262_v22, %v2168_v21  ;;  %v266_v28 = vstv %s265_s4  ;;  %s2385_s13 = sld [smem:[#allocation3 + $0x180]] }
  0x3b   : > { %1608 = vmatpush3.msra.mxu1 %v2045_v3  ;;  %v260_v25 = vadd.f32 %v259_v20, %v256_v19  ;;  %s2390_s14 = sld [smem:[#allocation3 + $0x181]] }
  0x3c   : > { %1609 = vmatprep.subr.mxu1 %v1937_v4  ;;  %v301_v39 = vstv %s1404_s30  ;;  %s2392_s15 = sld [smem:[#allocation3 + $0x80]] }
  0x3d   : > { %349 = vrot.lane.b32.xlu0 %v2079_v7, %s1936_s12  ;;  %347 = vrot.lane.b32.xlu1 %v2084_v8, %s1936_s12  ;;  %v264_v27 = vadd.f32 %v263_v26, %v260_v25  ;;  %v304_v40 = vstv %s1405_s6  ;;  %v302_v41 = vmul.f32 %v301_v39, %v2136_v13  ;;  %s2394_s16 = sld [smem:[#allocation3 + $0x81]] }
  0x3e   : > { %1610 = vmatpush3.msra.mxu1 %v2059_v5  ;;  %v305_v42 = vmul.f32 %v304_v40, %v2139_v14  ;;  %v308_v45 = vstv %s1406_s7  ;;  %s2402_s17 = sld [smem:[#allocation3 + $0x182]] }
  0x3f   : > { %1611 = vmatprep.subr.mxu1 %v1937_v4  ;;  %v267_v29 = vadd.f32 %v266_v28, %v264_v27  ;;  %v309_v47 = vmul.f32 %v308_v45, %v2168_v21  ;;  %v312_v53 = vstv %s1407_s8  ;;  %s2404_s18 = sld [smem:[#allocation3 + $0x82]] }
  0x40   : > { %1612 = vmatpush3.msra.mxu1 %v2064_v6  ;;  %v306_v46 = vadd.f32 %v305_v42, %v302_v41  ;;  %s2424_s19 = sld [smem:[#allocation5 + $0x3]] }
  0x41   : > { %345 = vrot.lane.b32.xlu0 %v2099_v9, %s1936_s12  ;;  %343 = vrot.lane.b32.xlu1 %v2104_v10, %s1936_s12  ;;  %v268_v30 = vmax.f32 %v267_v29, 0.0  ;;  %s2430_s22 = sld [smem:[#allocation5 + $0x1]] }
  0x42   : > { %1613 = vmatprep.subr.mxu1 %v1937_v4  ;;  %v310_v50 = vadd.f32 %v309_v47, %v306_v46  ;;  %s1412_s4 = sld [smem:[#allocation3 + $0x200]] }
  0x43   : > { %1614 = vmatpush3.msra.mxu1 %v2079_v7  ;;  %s1413_s23 = sld [smem:[#allocation3 + $0x201]] }
  0x44   : > { %1615 = vmatprep.subr.mxu1 %v1937_v4  ;;  %v313_v54 = vadd.f32 %v312_v53, %v310_v50  ;;  %v527_v39 = vstv %s2402_s17  ;;  %s1416_s24 = sld [smem:[#allocation3 + $0x280]] }
  0x45   : > { %341 = vrot.lane.b32.xlu0 %v2123_v11, %s1936_s12  ;;  %339 = vrot.lane.b32.xlu1 %v2128_v12, %s1936_s12  ;;  %v293_v40 = vstv %s2404_s18  ;;  %s1417_s25 = sld [smem:[#allocation3 + $0x281]] }
  0x46   : > { %1616 = vmatpush3.msra.mxu1 %v2084_v8  ;;  %v314_v57 = vmax.f32 %v313_v54, 0.0  ;;  %v294_v45 = vmul.f32 %v293_v40, %v2168_v21  ;;  %s2502_s26 = sld [smem:[#allocation3 + $0x202]] }
  0x47   : > { %1617 = vmatprep.subr.mxu1 %v1937_v4  ;;  %v297_v50 = vstv %s2430_s22  ;;  %s2549_s30 = sld [smem:[#allocation3 + $0x301]] }
  0x48   : > { %1618 = vmatpush3.msra.mxu1 %v2099_v9  ;;  %s2552_s6 = sld [smem:[#allocation3 + $0x380]] }
  0x49   : > { %337 = vrot.lane.b32.xlu0 %v2149_v17, %s1936_s12  ;;  %335 = vrot.lane.b32.xlu1 %v2154_v18, %s1936_s12  ;;  %s2554_s7 = sld [smem:[#allocation3 + $0x381]] }
  0x4a   : > { %1619 = vmatprep.subr.mxu1 %v1937_v4  ;;  %s2558_s8 = sld [smem:[#allocation3 + $0x302]] }
  0x4b   : > { %1620 = vmatpush3.msra.mxu1 %v2104_v10 }
  0x4c   : > { %1621 = vmatprep.subr.mxu1 %v1937_v4 }
  0x4d   : > { %333 = vrot.lane.b32.xlu0 %v2174_v23, %s1936_s12  ;;  %331 = vrot.lane.b32.xlu1 %v2179_v24, %s1936_s12  ;;  %s1941_s12 = smov 124  }
  0x4e   : > { %1622 = vmatpush3.msra.mxu1 %v2123_v11 }
  0x4f   : > { %1623 = vmatprep.subr.mxu1 %v1937_v4 }
  0x50   : > { %1624 = vmatpush3.msra.mxu1 %v2128_v12 }
  0x51   : > { %564 = vrot.lane.b32.xlu0 %v2026_v0, %s1939_s27  ;;  %682 = vrot.lane.b32.xlu1 %v2026_v0, %s1940_s28 }
  0x52   : > { %1625 = vmatprep.subr.mxu1 %v1937_v4 }
  0x53   : > { %1626 = vmatpush3.msra.mxu1 %v2149_v17 }
  0x54   : > { %1627 = vmatprep.subr.mxu1 %v1937_v4 }
  0x55   : > { %562 = vrot.lane.b32.xlu0 %v2040_v2, %s1939_s27  ;;  %680 = vrot.lane.b32.xlu1 %v2040_v2, %s1940_s28 }
  0x56   : > { %1628 = vmatpush3.msra.mxu1 %v2154_v18 }
  0x57   : > { %1629 = vmatprep.subr.mxu1 %v1937_v4 }
  0x58   : > { %1630 = vmatpush3.msra.mxu1 %v2174_v23 }
  0x59   : > { %560 = vrot.lane.b32.xlu0 %v2031_v1, %s1939_s27  ;;  %678 = vrot.lane.b32.xlu1 %v2031_v1, %s1940_s28 }
  0x5a   : > { %1631 = vmatprep.subr.mxu1 %v1937_v4 }
  0x5b   : > { %1632 = vmatpush3.msra.mxu1 %v2179_v24 }
  0x5c   : > { %1671 = vmatprep.subr.mxu1 %v1937_v4  ;;  %1634 = vmatmul.mubr.f32.vlgmr.msra.gmra.mxu1 %v268_v30  ;;  %v520_v30 = vstv %s2385_s13  ;;  %s1427_s13 = sld [smem:[#allocation5 + $0x7]] }
  0x5d   : > { %558 = vrot.lane.b32.xlu0 %v2045_v3, %s1939_s27  ;;  %676 = vrot.lane.b32.xlu1 %v2045_v3, %s1940_s28 }
  0x5e   : > { %1703 = vmatprep.mubr.msk.f32.mxu1 %vm1938_vm0, %v1937_v4 }
  0x61   : > { %556 = vrot.lane.b32.xlu0 %v2059_v5, %s1939_s27  ;;  %674 = vrot.lane.b32.xlu1 %v2059_v5, %s1940_s28 }
  0x65   : > { %554 = vrot.lane.b32.xlu0 %v2064_v6, %s1939_s27  ;;  %672 = vrot.lane.b32.xlu1 %v2064_v6, %s1940_s28 }
  0x69   : > { %552 = vrot.lane.b32.xlu0 %v2079_v7, %s1939_s27  ;;  %670 = vrot.lane.b32.xlu1 %v2079_v7, %s1940_s28 }
  0x6d   : > { %550 = vrot.lane.b32.xlu0 %v2084_v8, %s1939_s27  ;;  %668 = vrot.lane.b32.xlu1 %v2084_v8, %s1940_s28 }
  0x71   : > { %548 = vrot.lane.b32.xlu0 %v2099_v9, %s1939_s27  ;;  %666 = vrot.lane.b32.xlu1 %v2099_v9, %s1940_s28 }
  0x75   : > { %546 = vrot.lane.b32.xlu0 %v2104_v10, %s1939_s27  ;;  %664 = vrot.lane.b32.xlu1 %v2104_v10, %s1940_s28 }
  0x79   : > { %544 = vrot.lane.b32.xlu0 %v2123_v11, %s1939_s27  ;;  %662 = vrot.lane.b32.xlu1 %v2123_v11, %s1940_s28 }
  0x7d   : > { %542 = vrot.lane.b32.xlu0 %v2128_v12, %s1939_s27  ;;  %660 = vrot.lane.b32.xlu1 %v2128_v12, %s1940_s28 }
  0x81   : > { %540 = vrot.lane.b32.xlu0 %v2149_v17, %s1939_s27  ;;  %658 = vrot.lane.b32.xlu1 %v2149_v17, %s1940_s28 }
  0x85   : > { %538 = vrot.lane.b32.xlu0 %v2154_v18, %s1939_s27  ;;  %656 = vrot.lane.b32.xlu1 %v2154_v18, %s1940_s28 }
  0x89   : > { %536 = vrot.lane.b32.xlu0 %v2174_v23, %s1939_s27  ;;  %654 = vrot.lane.b32.xlu1 %v2174_v23, %s1940_s28 }
  0x8d   : > { %534 = vrot.lane.b32.xlu0 %v2179_v24, %s1939_s27  ;;  %652 = vrot.lane.b32.xlu1 %v2179_v24, %s1940_s28  ;;  %s2504_s27 = sld [smem:[#allocation3 + $0x282]] }
  0x8e   : > { %s1415_s28 = sld [smem:[#allocation5 + $0x4]] }
  0x91   : > { %815 = vrot.lane.b32.xlu0 %v2026_v0, %s1941_s12  ;;  %949 = vrot.lane.b32.xlu1 %v2026_v0, %s1942_s29 }
  0x95   : > { %813 = vrot.lane.b32.xlu0 %v2040_v2, %s1941_s12  ;;  %947 = vrot.lane.b32.xlu1 %v2040_v2, %s1942_s29 }
  0x99   : > { %811 = vrot.lane.b32.xlu0 %v2031_v1, %s1941_s12  ;;  %945 = vrot.lane.b32.xlu1 %v2031_v1, %s1942_s29 }
  0x9d   : > { %809 = vrot.lane.b32.xlu0 %v2045_v3, %s1941_s12  ;;  %943 = vrot.lane.b32.xlu1 %v2045_v3, %s1942_s29 }
  0xa1   : > { %807 = vrot.lane.b32.xlu0 %v2059_v5, %s1941_s12  ;;  %941 = vrot.lane.b32.xlu1 %v2059_v5, %s1942_s29 }
  0xa3   : > { %v362_v31 = vpop.permute.xlu0 %361  ;;  %v358_v32 = vpop.permute.xlu1 %357 }
  0xa4   : > { %1567 = vmatpush3.msra.mxu0 %v362_v31  ;;  %v523_v31 = vstv %s2390_s14  ;;  %s1397_s14 = sshll.u32 %s2610_s21, 3 }
  0xa5   : > { %805 = vrot.lane.b32.xlu0 %v2064_v6, %s1941_s12  ;;  %939 = vrot.lane.b32.xlu1 %v2064_v6, %s1942_s29  ;;  %s250_s17 = scalar_lea.vmem %s2599_s5, %s1397_s14 }
  0xa6   : > { %1568 = vmatprep.subr.mxu0 %v1937_v4 }
  0xa7   : > { %v360_v33 = vpop.permute.xlu0 %359  ;;  %v356_v34 = vpop.permute.xlu1 %355 }
  0xa8   : > { %1569 = vmatpush3.msra.mxu0 %v360_v33  ;;  %v289_v33 = vstv %s2394_s16 }
  0xa9   : > { %1570 = vmatprep.subr.mxu0 %v1937_v4  ;;  %803 = vrot.lane.b32.xlu0 %v2079_v7, %s1941_s12 }
  0xaa   : > { %937 = vrot.lane.b32.xlu1 %v2079_v7, %s1942_s29  ;;  %1571 = vmatpush3.msra.mxu0 %v358_v32  ;;  %v286_v32 = vstv %s2392_s15 }
  0xab   : > { %1572 = vmatprep.subr.mxu0 %v1937_v4  ;;  %v354_v35 = vpop.permute.xlu0 %353  ;;  %v352_v36 = vpop.permute.xlu1 %351 }
  0xac   : > { %1573 = vmatpush3.msra.mxu0 %v356_v34 }
  0xad   : > { %1574 = vmatprep.subr.mxu0 %v1937_v4  ;;  %801 = vrot.lane.b32.xlu0 %v2084_v8, %s1941_s12 }
  0xae   : > { %935 = vrot.lane.b32.xlu1 %v2084_v8, %s1942_s29  ;;  %1575 = vmatpush3.msra.mxu0 %v354_v35  ;;  %v521_v35 = vmul.f32 %v520_v30, %v2136_v13 }
  0xaf   : > { %1576 = vmatprep.subr.mxu0 %v1937_v4  ;;  %v350_v37 = vpop.permute.xlu0 %349  ;;  %v348_v38 = vpop.permute.xlu1 %347 }
  0xb0   : > { %1577 = vmatpush3.msra.mxu0 %v352_v36  ;;  %v524_v36 = vmul.f32 %v523_v31, %v2139_v14 }
  0xb1   : > { %1578 = vmatprep.subr.mxu0 %v1937_v4  ;;  %799 = vrot.lane.b32.xlu0 %v2099_v9, %s1941_s12 }
  0xb2   : > { %933 = vrot.lane.b32.xlu1 %v2099_v9, %s1942_s29  ;;  %1579 = vmatpush3.msra.mxu0 %v350_v37  ;;  %v287_v37 = vmul.f32 %v286_v32, %v2136_v13  ;;  %v525_v42 = vadd.f32 %v524_v36, %v521_v35  ;;  %v778_v32 = vstv %s2502_s26  ;;  %v912_v36 = vstv %s2504_s27 }
  0xb3   : > { %1580 = vmatprep.subr.mxu0 %v1937_v4  ;;  %v346_v43 = vpop.permute.xlu0 %345  ;;  %v344_v44 = vpop.permute.xlu1 %343 }
  0xb4   : > { %1581 = vmatpush3.msra.mxu0 %v348_v38  ;;  %v290_v38 = vmul.f32 %v289_v33, %v2139_v14 }
  0xb5   : > { %1582 = vmatprep.subr.mxu0 %v1937_v4  ;;  %797 = vrot.lane.b32.xlu0 %v2104_v10, %s1941_s12 }
  0xb6   : > { %931 = vrot.lane.b32.xlu1 %v2104_v10, %s1942_s29  ;;  %1583 = vmatpush3.msra.mxu0 %v346_v43  ;;  %v528_v43 = vmul.f32 %v527_v39, %v2168_v21 }
  0xb7   : > { %1584 = vmatprep.subr.mxu0 %v1937_v4  ;;  %v342_v48 = vpop.permute.xlu0 %341  ;;  %v340_v49 = vpop.permute.xlu1 %339 }
  0xb8   : > { %1585 = vmatpush3.msra.mxu0 %v344_v44  ;;  %v291_v44 = vadd.f32 %v290_v38, %v287_v37  ;;  %v529_v47 = vadd.f32 %v528_v43, %v525_v42  ;;  %v779_v38 = vmul.f32 %v778_v32, %v2168_v21 }
  0xb9   : > { %1586 = vmatprep.subr.mxu0 %v1937_v4  ;;  %795 = vrot.lane.b32.xlu0 %v2123_v11, %s1941_s12 }
  0xba   : > { %929 = vrot.lane.b32.xlu1 %v2123_v11, %s1942_s29  ;;  %1587 = vmatpush3.msra.mxu0 %v342_v48  ;;  %v295_v48 = vadd.f32 %v294_v45, %v291_v44 }
  0xbb   : > { %1588 = vmatprep.subr.mxu0 %v1937_v4  ;;  %v338_v51 = vpop.permute.xlu0 %337  ;;  %v336_v52 = vpop.permute.xlu1 %335 }
  0xbc   : > { %1589 = vmatpush3.msra.mxu0 %v340_v49  ;;  %v531_v49 = vstv %s2424_s19  ;;  %v298_v53 = vadd.f32 %v297_v50, %v295_v48 }
  0xbd   : > { %1590 = vmatprep.subr.mxu0 %v1937_v4  ;;  %793 = vrot.lane.b32.xlu0 %v2128_v12, %s1941_s12 }
  0xbe   : > { %927 = vrot.lane.b32.xlu1 %v2128_v12, %s1942_s29  ;;  %1591 = vmatpush3.msra.mxu0 %v338_v51 }
  0xbf   : > { %1592 = vmatprep.subr.mxu0 %v1937_v4  ;;  %v334_v55 = vpop.permute.xlu0 %333  ;;  %v332_v56 = vpop.permute.xlu1 %331 }
  0xc0   : > { %1593 = vmatpush3.msra.mxu0 %v336_v52  ;;  %v532_v52 = vadd.f32 %v531_v49, %v529_v47 }
  0xc1   : > { %1594 = vmatprep.subr.mxu0 %v1937_v4  ;;  %791 = vrot.lane.b32.xlu0 %v2149_v17, %s1941_s12 }
  0xc2   : > { %925 = vrot.lane.b32.xlu1 %v2149_v17, %s1942_s29  ;;  %1595 = vmatpush3.msra.mxu0 %v334_v55  ;;  %v533_v55 = vmax.f32 %v532_v52, 0.0 }
  0xc3   : > { %1596 = vmatprep.subr.mxu0 %v1937_v4  ;;  %v565_v58 = vpop.permute.xlu0 %564  ;;  %v683_v59 = vpop.permute.xlu1 %682 }
  0xc4   : > { %1597 = vmatpush3.msra.mxu0 %v332_v56  ;;  %1672 = vmatpush3.msra.mxu1 %v683_v59  ;;  %v299_v56 = vmax.f32 %v298_v53, 0.0 }
  0xc5   : > { %789 = vrot.lane.b32.xlu0 %v2154_v18, %s1941_s12  ;;  %1636 = vmatprep.subr.mxu0 %v1937_v4 }
  0xc6   : > { %923 = vrot.lane.b32.xlu1 %v2154_v18, %s1942_s29  ;;  %1599 = vmatmul.mubr.f32.vlgmr.msra.gmra.mxu0 %v314_v57 }
  0xc7   : > { %1637 = vmatpush3.msra.mxu0 %v565_v58  ;;  %v563_v60 = vpop.permute.xlu0 %562  ;;  %v681_v61 = vpop.permute.xlu1 %680  ;;  %1673 = vmatprep.subr.mxu1 %v1937_v4 }
  0xc8   : > { %1638 = vmatprep.subr.mxu0 %v1937_v4  ;;  %1674 = vmatpush3.msra.mxu1 %v681_v61 }
  0xc9   : > { %1639 = vmatpush3.msra.mxu0 %v563_v60  ;;  %787 = vrot.lane.b32.xlu0 %v2174_v23, %s1941_s12 }
  0xca   : > { %921 = vrot.lane.b32.xlu1 %v2174_v23, %s1942_s29  ;;  %1640 = vmatprep.subr.mxu0 %v1937_v4 }
  0xcb   : > { %v561_v62 = vpop.permute.xlu0 %560  ;;  %v679_v63 = vpop.permute.xlu1 %678  ;;  %1675 = vmatprep.subr.mxu1 %v1937_v4  ;;  %1668 = vmatprep.mubr.msk.f32.mxu0 %vm1938_vm0, %v1937_v4 }
  0xcc   : > { %1641 = vmatpush3.msra.mxu0 %v561_v62  ;;  %1676 = vmatpush3.msra.mxu1 %v679_v63 }
  0xcd   : > { %785 = vrot.lane.b32.xlu0 %v2179_v24, %s1941_s12  ;;  %1642 = vmatprep.subr.mxu0 %v1937_v4  ;;  %s1419_s12 = sld [smem:[#allocation5 + $0x5]] }
  0xce   : > { %919 = vrot.lane.b32.xlu1 %v2179_v24, %s1942_s29  ;;  %1677 = vmatprep.subr.mxu1 %v1937_v4  ;;  %s2546_s29 = sld [smem:[#allocation3 + $0x300]] }
  0xcf   : > { %v559_v15 = vpop.permute.xlu0 %558  ;;  %v677_v16 = vpop.permute.xlu1 %676 }
  0xd0   : > { %1643 = vmatpush3.msra.mxu0 %v559_v15  ;;  %1678 = vmatpush3.msra.mxu1 %v677_v16 }
  0xd1   : > { %1083 = vrot.lane.b32.xlu0 %v2026_v0, %s1943_s9  ;;  %1644 = vmatprep.subr.mxu0 %v1937_v4 }
  0xd2   : > { %1217 = vrot.lane.b32.xlu1 %v2026_v0, %s1944_s11  ;;  %1679 = vmatprep.subr.mxu1 %v1937_v4 }
  0xd3   : > { %v557_v19 = vpop.permute.xlu0 %556  ;;  %v675_v20 = vpop.permute.xlu1 %674  ;;  %v916_v45 = vstv %s1419_s12 }
  0xd4   : > { %1645 = vmatpush3.msra.mxu0 %v557_v19  ;;  %1680 = vmatpush3.msra.mxu1 %v675_v20 }
  0xd5   : > { %1081 = vrot.lane.b32.xlu0 %v2040_v2, %s1943_s9  ;;  %1646 = vmatprep.subr.mxu0 %v1937_v4 }
  0xd6   : > { %1215 = vrot.lane.b32.xlu1 %v2040_v2, %s1944_s11  ;;  %1681 = vmatprep.subr.mxu1 %v1937_v4 }
  0xd7   : > { %v555_v22 = vpop.permute.xlu0 %554  ;;  %v673_v25 = vpop.permute.xlu1 %672 }
  0xd8   : > { %1647 = vmatpush3.msra.mxu0 %v555_v22  ;;  %1682 = vmatpush3.msra.mxu1 %v673_v25 }
  0xd9   : > { %1079 = vrot.lane.b32.xlu0 %v2031_v1, %s1943_s9  ;;  %1648 = vmatprep.subr.mxu0 %v1937_v4 }
  0xda   : > { %1213 = vrot.lane.b32.xlu1 %v2031_v1, %s1944_s11  ;;  %1683 = vmatprep.subr.mxu1 %v1937_v4 }
  0xdb   : > { %v553_v0 = vpop.permute.xlu0 %552  ;;  %v671_v26 = vpop.permute.xlu1 %670 }
  0xdc   : > { %1649 = vmatpush3.msra.mxu0 %v553_v0  ;;  %1684 = vmatpush3.msra.mxu1 %v671_v26 }
  0xdd   : > { %1077 = vrot.lane.b32.xlu0 %v2045_v3, %s1943_s9  ;;  %1650 = vmatprep.subr.mxu0 %v1937_v4 }
  0xde   : > { %1211 = vrot.lane.b32.xlu1 %v2045_v3, %s1944_s11  ;;  %1685 = vmatprep.subr.mxu1 %v1937_v4 }
  0xdf   : > { %v551_v2 = vpop.permute.xlu0 %550  ;;  %v669_v27 = vpop.permute.xlu1 %668 }
  0xe0   : > { %1651 = vmatpush3.msra.mxu0 %v551_v2  ;;  %1686 = vmatpush3.msra.mxu1 %v669_v27 }
  0xe1   : > { %1075 = vrot.lane.b32.xlu0 %v2059_v5, %s1943_s9  ;;  %1652 = vmatprep.subr.mxu0 %v1937_v4 }
  0xe2   : > { %1209 = vrot.lane.b32.xlu1 %v2059_v5, %s1944_s11  ;;  %1687 = vmatprep.subr.mxu1 %v1937_v4 }
  0xe3   : > { %v549_v1 = vpop.permute.xlu0 %548  ;;  %v667_v3 = vpop.permute.xlu1 %666 }
  0xe4   : > { %1653 = vmatpush3.msra.mxu0 %v549_v1  ;;  %1688 = vmatpush3.msra.mxu1 %v667_v3  ;;  %v771_v1 = vstv %s1412_s4  ;;  %v774_v3 = vstv %s1413_s23 }
  0xe5   : > { %1073 = vrot.lane.b32.xlu0 %v2064_v6, %s1943_s9  ;;  %1654 = vmatprep.subr.mxu0 %v1937_v4  ;;  %v772_v30 = vmul.f32 %v771_v1, %v2136_v13  ;;  %v775_v31 = vmul.f32 %v774_v3, %v2139_v14  ;;  %v1886_v1 = vld [vmem:[%s2116_s10 + $0x8] sm:$0xff] }
  0xe6   : > { %1207 = vrot.lane.b32.xlu1 %v2064_v6, %s1944_s11  ;;  %1689 = vmatprep.subr.mxu1 %v1937_v4 }
  0xe7   : > { %v547_v5 = vpop.permute.xlu0 %546  ;;  %v665_v28 = vpop.permute.xlu1 %664  ;;  %v776_v37 = vadd.f32 %v775_v31, %v772_v30 }
  0xe8   : > { %1655 = vmatpush3.msra.mxu0 %v547_v5  ;;  %1690 = vmatpush3.msra.mxu1 %v665_v28 }
  0xe9   : > { %1071 = vrot.lane.b32.xlu0 %v2079_v7, %s1943_s9  ;;  %1656 = vmatprep.subr.mxu0 %v1937_v4 }
  0xea   : > { %1205 = vrot.lane.b32.xlu1 %v2079_v7, %s1944_s11  ;;  %1691 = vmatprep.subr.mxu1 %v1937_v4 }
  0xeb   : > { %v545_v6 = vpop.permute.xlu0 %544  ;;  %v663_v29 = vpop.permute.xlu1 %662 }
  0xec   : > { %1657 = vmatpush3.msra.mxu0 %v545_v6  ;;  %1692 = vmatpush3.msra.mxu1 %v663_v29  ;;  %v905_v6 = vstv %s1416_s24  ;;  %v908_v29 = vstv %s1417_s25 }
  0xed   : > { %1069 = vrot.lane.b32.xlu0 %v2084_v8, %s1943_s9  ;;  %1658 = vmatprep.subr.mxu0 %v1937_v4 }
  0xee   : > { %1203 = vrot.lane.b32.xlu1 %v2084_v8, %s1944_s11  ;;  %1693 = vmatprep.subr.mxu1 %v1937_v4 }
  0xef   : > { %v543_v7 = vpop.permute.xlu0 %542  ;;  %v661_v34 = vpop.permute.xlu1 %660 }
  0xf0   : > { %1659 = vmatpush3.msra.mxu0 %v543_v7  ;;  %1694 = vmatpush3.msra.mxu1 %v661_v34  ;;  %v906_v7 = vmul.f32 %v905_v6, %v2136_v13  ;;  %v909_v34 = vmul.f32 %v908_v29, %v2139_v14  ;;  %v780_v13 = vadd.f32 %v779_v38, %v776_v37  ;;  %v782_v14 = vstv %s1415_s28 }
  0xf1   : > { %1067 = vrot.lane.b32.xlu0 %v2099_v9, %s1943_s9  ;;  %1660 = vmatprep.subr.mxu0 %v1937_v4 }
  0xf2   : > { %1201 = vrot.lane.b32.xlu1 %v2099_v9, %s1944_s11  ;;  %1695 = vmatprep.subr.mxu1 %v1937_v4  ;;  %v910_v40 = vadd.f32 %v909_v34, %v906_v7 }
  0xf3   : > { %v541_v8 = vpop.permute.xlu0 %540  ;;  %v659_v41 = vpop.permute.xlu1 %658 }
  0xf4   : > { %1661 = vmatpush3.msra.mxu0 %v541_v8  ;;  %1696 = vmatpush3.msra.mxu1 %v659_v41  ;;  %v913_v8 = vmul.f32 %v912_v36, %v2168_v21 }
  0xf5   : > { %1065 = vrot.lane.b32.xlu0 %v2104_v10, %s1943_s9  ;;  %1662 = vmatprep.subr.mxu0 %v1937_v4 }
  0xf6   : > { %1199 = vrot.lane.b32.xlu1 %v2104_v10, %s1944_s11  ;;  %1697 = vmatprep.subr.mxu1 %v1937_v4  ;;  %v914_v43 = vadd.f32 %v913_v8, %v910_v40 }
  0xf7   : > { %v539_v9 = vpop.permute.xlu0 %538  ;;  %v657_v46 = vpop.permute.xlu1 %656 }
  0xf8   : > { %1663 = vmatpush3.msra.mxu0 %v539_v9  ;;  %1698 = vmatpush3.msra.mxu1 %v657_v46  ;;  %v783_v9 = vadd.f32 %v782_v14, %v780_v13  ;;  %v917_v46 = vadd.f32 %v916_v45, %v914_v43 }
  0xf9   : > { %1063 = vrot.lane.b32.xlu0 %v2123_v11, %s1943_s9  ;;  %1664 = vmatprep.subr.mxu0 %v1937_v4 }
  0xfa   : > { %1197 = vrot.lane.b32.xlu1 %v2123_v11, %s1944_s11  ;;  %1699 = vmatprep.subr.mxu1 %v1937_v4  ;;  %v784_v48 = vmax.f32 %v783_v9, 0.0  ;;  %v918_v50 = vmax.f32 %v917_v46, 0.0 }
  0xfb   : > { %v537_v10 = vpop.permute.xlu0 %536  ;;  %v655_v51 = vpop.permute.xlu1 %654 }
  0xfc   : > { %1665 = vmatpush3.msra.mxu0 %v537_v10  ;;  %1700 = vmatpush3.msra.mxu1 %v655_v51 }
  0xfd   : > { %1061 = vrot.lane.b32.xlu0 %v2128_v12, %s1943_s9  ;;  %1666 = vmatprep.subr.mxu0 %v1937_v4 }
  0xfe   : > { %1195 = vrot.lane.b32.xlu1 %v2128_v12, %s1944_s11  ;;  %1701 = vmatprep.subr.mxu1 %v1937_v4 }
  0xff   : > { %v535_v54 = vpop.permute.xlu0 %534  ;;  %v653_v11 = vpop.permute.xlu1 %652 }
 0x100   : > { %1667 = vmatpush3.msra.mxu0 %v535_v54  ;;  %1702 = vmatpush3.msra.mxu1 %v653_v11 }
 0x101   : > { %1059 = vrot.lane.b32.xlu0 %v2149_v17, %s1943_s9  ;;  %1706 = vmatprep.subr.mxu0 %v1937_v4 }
 0x102   : > { %1193 = vrot.lane.b32.xlu1 %v2149_v17, %s1944_s11  ;;  %1741 = vmatprep.subr.mxu1 %v1937_v4 }
 0x103   : > { %v816_v57 = vpop.permute.xlu0 %815  ;;  %v950_v12 = vpop.permute.xlu1 %949  ;;  %1669 = vmatmul.mubr.f32.vlgmr.msra.gmra.mxu0 %v533_v55  ;;  %1704 = vmatmul.mubr.f32.vlgmr.msra.gmra.mxu1 %v299_v56 }
 0x104   : > { %1707 = vmatpush3.msra.mxu0 %v816_v57  ;;  %1742 = vmatpush3.msra.mxu1 %v950_v12 }
 0x105   : > { %1057 = vrot.lane.b32.xlu0 %v2154_v18, %s1943_s9  ;;  %1708 = vmatprep.subr.mxu0 %v1937_v4 }
 0x106   : > { %1191 = vrot.lane.b32.xlu1 %v2154_v18, %s1944_s11  ;;  %1743 = vmatprep.subr.mxu1 %v1937_v4 }
 0x107   : > { %v814_v58 = vpop.permute.xlu0 %813  ;;  %v948_v17 = vpop.permute.xlu1 %947  ;;  %1738 = vmatprep.mubr.msk.f32.mxu0 %vm1938_vm0, %v1937_v4  ;;  %1773 = vmatprep.mubr.msk.f32.mxu1 %vm1938_vm0, %v1937_v4 }
 0x108   : > { %1709 = vmatpush3.msra.mxu0 %v814_v58  ;;  %1744 = vmatpush3.msra.mxu1 %v948_v17 }
 0x109   : > { %1055 = vrot.lane.b32.xlu0 %v2174_v23, %s1943_s9  ;;  %1710 = vmatprep.subr.mxu0 %v1937_v4 }
 0x10a   : > { %1189 = vrot.lane.b32.xlu1 %v2174_v23, %s1944_s11  ;;  %1745 = vmatprep.subr.mxu1 %v1937_v4 }
 0x10b   : > { %v812_v18 = vpop.permute.xlu0 %811  ;;  %v946_v59 = vpop.permute.xlu1 %945 }
 0x10c   : > { %1711 = vmatpush3.msra.mxu0 %v812_v18  ;;  %1746 = vmatpush3.msra.mxu1 %v946_v59 }
 0x10d   : > { %1053 = vrot.lane.b32.xlu0 %v2179_v24, %s1943_s9  ;;  %1712 = vmatprep.subr.mxu0 %v1937_v4  ;;  %s2560_s9 = sld [smem:[#allocation3 + $0x382]] }
 0x10e   : > { %1187 = vrot.lane.b32.xlu1 %v2179_v24, %s1944_s11  ;;  %1747 = vmatprep.subr.mxu1 %v1937_v4  ;;  %s2573_s11 = sld [smem:[#allocation5 + $0x6]] }
 0x10f   : > { %v810_v60 = vpop.permute.xlu0 %809  ;;  %v944_v61 = vpop.permute.xlu1 %943 }
 0x110   : > { %1713 = vmatpush3.msra.mxu0 %v810_v60  ;;  %1748 = vmatpush3.msra.mxu1 %v944_v61 }
 0x111   : > { %1714 = vmatprep.subr.mxu0 %v1937_v4  ;;  %1749 = vmatprep.subr.mxu1 %v1937_v4 }
 0x113   : > { %v808_v23 = vpop.permute.xlu0 %807  ;;  %v942_v62 = vpop.permute.xlu1 %941  ;;  %v1180_v30 = vstv %s2560_s9 }
 0x114   : > { %1715 = vmatpush3.msra.mxu0 %v808_v23  ;;  %1750 = vmatpush3.msra.mxu1 %v942_v62 }
 0x115   : > { %1716 = vmatprep.subr.mxu0 %v1937_v4  ;;  %1751 = vmatprep.subr.mxu1 %v1937_v4 }
 0x117   : > { %v806_v63 = vpop.permute.xlu0 %805  ;;  %v940_v24 = vpop.permute.xlu1 %939 }
 0x118   : > { %1717 = vmatpush3.msra.mxu0 %v806_v63  ;;  %1752 = vmatpush3.msra.mxu1 %v940_v24 }
 0x119   : > { %1718 = vmatprep.subr.mxu0 %v1937_v4  ;;  %1753 = vmatprep.subr.mxu1 %v1937_v4 }
 0x11b   : > { %v804_v15 = vpop.permute.xlu0 %803 }
 0x11c   : > { %v938_v16 = vpop.permute.xlu1 %937  ;;  %1719 = vmatpush3.msra.mxu0 %v804_v15  ;;  %v2494_v19 = vpop.f32.mrf.mxu1 }
 0x11d   : > { %1754 = vmatpush3.msra.mxu1 %v938_v16  ;;  %1720 = vmatprep.subr.mxu0 %v1937_v4  ;;  %v1039_v16 = vstv %s2546_s29 }
 0x11e   : > { %1755 = vmatprep.subr.mxu1 %v1937_v4  ;;  %v1635_v20 = vpop.f32.mrf.mxu1 }
 0x11f   : > { %v802_v22 = vpop.permute.xlu0 %801  ;;  %v1042_v20 = vstv %s2549_s30 }
 0x120   : > { %v936_v25 = vpop.permute.xlu1 %935  ;;  %1721 = vmatpush3.msra.mxu0 %v802_v22  ;;  %v1043_v3 = vmul.f32 %v1886_v1, %v1042_v20 }
 0x121   : > { %1756 = vmatpush3.msra.mxu1 %v936_v25  ;;  %1722 = vmatprep.subr.mxu0 %v1937_v4  ;;  %v1173_v25 = vstv %s2552_s6 }
 0x122   : > { %1757 = vmatprep.subr.mxu1 %v1937_v4 }
 0x123   : > { %v800_v0 = vpop.permute.xlu0 %799 }
 0x124   : > { %v934_v26 = vpop.permute.xlu1 %933  ;;  %1723 = vmatpush3.msra.mxu0 %v800_v0  ;;  %v1176_v0 = vstv %s2554_s7 }
 0x125   : > { %1758 = vmatpush3.msra.mxu1 %v934_v26  ;;  %1724 = vmatprep.subr.mxu0 %v1937_v4  ;;  %v1177_v6 = vmul.f32 %v1886_v1, %v1176_v0 }
 0x126   : > { %1759 = vmatprep.subr.mxu1 %v1937_v4 }
 0x127   : > { %v798_v2 = vpop.permute.xlu0 %797 }
 0x128   : > { %v932_v27 = vpop.permute.xlu1 %931  ;;  %1725 = vmatpush3.msra.mxu0 %v798_v2  ;;  %v1885_v2 = vld [vmem:[%s2116_s10] sm:$0xff] }
 0x129   : > { %1760 = vmatpush3.msra.mxu1 %v932_v27  ;;  %1726 = vmatprep.subr.mxu0 %v1937_v4  ;;  %v1040_v27 = vmul.f32 %v1885_v2, %v1039_v16 }
 0x12a   : > { %1761 = vmatprep.subr.mxu1 %v1937_v4 }
 0x12b   : > { %v796_v5 = vpop.permute.xlu0 %795  ;;  %v1044_v32 = vadd.f32 %v1043_v3, %v1040_v27 }
 0x12c   : > { %v930_v28 = vpop.permute.xlu1 %929  ;;  %1727 = vmatpush3.msra.mxu0 %v796_v5  ;;  %v1046_v5 = vstv %s2558_s8 }
 0x12d   : > { %1762 = vmatpush3.msra.mxu1 %v930_v28  ;;  %1728 = vmatprep.subr.mxu0 %v1937_v4  ;;  %v1174_v28 = vmul.f32 %v1885_v2, %v1173_v25 }
 0x12e   : > { %1763 = vmatprep.subr.mxu1 %v1937_v4 }
 0x12f   : > { %v794_v33 = vpop.permute.xlu0 %793  ;;  %v1178_v34 = vadd.f32 %v1177_v6, %v1174_v28 }
 0x130   : > { %v928_v35 = vpop.permute.xlu1 %927  ;;  %1729 = vmatpush3.msra.mxu0 %v794_v33  ;;  %v1887_v33 = vld [vmem:[%s2116_s10 + $0x10] sm:$0xff]  ;;  %s1307_s10 = sld [smem:[#allocation2]] }
 0x131   : > { %1764 = vmatpush3.msra.mxu1 %v928_v35  ;;  %1730 = vmatprep.subr.mxu0 %v1937_v4  ;;  %v1047_v7 = vmul.f32 %v1887_v33, %v1046_v5  ;;  %v1181_v35 = vmul.f32 %v1887_v33, %v1180_v30 }
 0x132   : > { %1765 = vmatprep.subr.mxu1 %v1937_v4 }
 0x133   : > { %v792_v39 = vpop.permute.xlu0 %791  ;;  %v1048_v38 = vadd.f32 %v1047_v7, %v1044_v32  ;;  %v1182_v40 = vadd.f32 %v1181_v35, %v1178_v34 }
 0x134   : > { %v926_v41 = vpop.permute.xlu1 %925  ;;  %1731 = vmatpush3.msra.mxu0 %v792_v39  ;;  %v1050_v39 = vstv %s2573_s11 }
 0x135   : > { %1766 = vmatpush3.msra.mxu1 %v926_v41  ;;  %1732 = vmatprep.subr.mxu0 %v1937_v4  ;;  %v1184_v41 = vstv %s1427_s13  ;;  %v1051_v14 = vadd.f32 %v1050_v39, %v1048_v38 }
 0x136   : > { %1767 = vmatprep.subr.mxu1 %v1937_v4 }
 0x137   : > { %v790_v42 = vpop.permute.xlu0 %789  ;;  %v1052_v45 = vmax.f32 %v1051_v14, 0.0 }
 0x138   : > { %v924_v44 = vpop.permute.xlu1 %923  ;;  %1733 = vmatpush3.msra.mxu0 %v790_v42  ;;  %v1185_v42 = vadd.f32 %v1184_v41, %v1182_v40 }
 0x139   : > { %1768 = vmatpush3.msra.mxu1 %v924_v44  ;;  %1734 = vmatprep.subr.mxu0 %v1937_v4 }
 0x13a   : > { %1769 = vmatprep.subr.mxu1 %v1937_v4  ;;  %v1186_v9 = vmax.f32 %v1185_v42, 0.0 }
 0x13b   : > { %v788_v21 = vpop.permute.xlu0 %787 }
 0x13c   : > { %v922_v47 = vpop.permute.xlu1 %921  ;;  %1735 = vmatpush3.msra.mxu0 %v788_v21 }
 0x13d   : > { %1770 = vmatpush3.msra.mxu1 %v922_v47  ;;  %1736 = vmatprep.subr.mxu0 %v1937_v4 }
 0x13e   : > { %1771 = vmatprep.subr.mxu1 %v1937_v4 }
 0x13f   : > { %v786_v49 = vpop.permute.xlu0 %785 }
 0x140   : > { %v920_v10 = vpop.permute.xlu1 %919  ;;  %1737 = vmatpush3.msra.mxu0 %v786_v49 }
 0x141   : > { %1772 = vmatpush3.msra.mxu1 %v920_v10  ;;  %1739 = vmatmul.mubr.f32.vlgmr.msra.gmra.mxu0 %v784_v48 }
 0x142   : > { %1776 = vmatprep.subr.mxu0 %v1937_v4  ;;  %1811 = vmatprep.subr.mxu1 %v1937_v4 }
 0x143   : > { %v1084_v51 = vpop.permute.xlu0 %1083  ;;  %1774 = vmatmul.mubr.f32.vlgmr.msra.gmra.mxu1 %v918_v50  ;;  %1808 = vmatprep.mubr.msk.f32.mxu0 %vm1938_vm0, %v1937_v4 }
 0x144   : > { %v1218_v52 = vpop.permute.xlu1 %1217  ;;  %1777 = vmatpush3.msra.mxu0 %v1084_v51  ;;  %1843 = vmatprep.mubr.msk.f32.mxu1 %vm1938_vm0, %v1937_v4 }
 0x145   : > { %1812 = vmatpush3.msra.mxu1 %v1218_v52  ;;  %1778 = vmatprep.subr.mxu0 %v1937_v4 }
 0x146   : > { %1813 = vmatprep.subr.mxu1 %v1937_v4 }
 0x147   : > { %v1082_v53 = vpop.permute.xlu0 %1081 }
 0x148   : > { %v1216_v54 = vpop.permute.xlu1 %1215  ;;  %1779 = vmatpush3.msra.mxu0 %v1082_v53 }
 0x149   : > { %1814 = vmatpush3.msra.mxu1 %v1216_v54  ;;  %1780 = vmatprep.subr.mxu0 %v1937_v4 }
 0x14a   : > { %1815 = vmatprep.subr.mxu1 %v1937_v4 }
 0x14b   : > { %v1080_v11 = vpop.permute.xlu0 %1079 }
 0x14c   : > { %v1214_v55 = vpop.permute.xlu1 %1213  ;;  %1781 = vmatpush3.msra.mxu0 %v1080_v11 }
 0x14d   : > { %1816 = vmatpush3.msra.mxu1 %v1214_v55  ;;  %1782 = vmatprep.subr.mxu0 %v1937_v4 }
 0x14e   : > { %1817 = vmatprep.subr.mxu1 %v1937_v4 }
 0x14f   : > { %v1078_v56 = vpop.permute.xlu0 %1077 }
 0x150   : > { %v1212_v57 = vpop.permute.xlu1 %1211  ;;  %1783 = vmatpush3.msra.mxu0 %v1078_v56 }
 0x151   : > { %1818 = vmatpush3.msra.mxu1 %v1212_v57  ;;  %1784 = vmatprep.subr.mxu0 %v1937_v4 }
 0x152   : > { %1819 = vmatprep.subr.mxu1 %v1937_v4 }
 0x153   : > { %v1076_v12 = vpop.permute.xlu0 %1075 }
 0x154   : > { %v1210_v58 = vpop.permute.xlu1 %1209  ;;  %1785 = vmatpush3.msra.mxu0 %v1076_v12 }
 0x155   : > { %1820 = vmatpush3.msra.mxu1 %v1210_v58  ;;  %1786 = vmatprep.subr.mxu0 %v1937_v4 }
 0x156   : > { %1821 = vmatprep.subr.mxu1 %v1937_v4 }
 0x157   : > { %v1074_v17 = vpop.permute.xlu0 %1073 }
 0x158   : > { %v1208_v18 = vpop.permute.xlu1 %1207  ;;  %1787 = vmatpush3.msra.mxu0 %v1074_v17 }
 0x159   : > { %1822 = vmatpush3.msra.mxu1 %v1208_v18  ;;  %1788 = vmatprep.subr.mxu0 %v1937_v4 }
 0x15a   : > { %1823 = vmatprep.subr.mxu1 %v1937_v4 }
 0x15b   : > { %v1072_v59 = vpop.permute.xlu0 %1071 }
 0x15c   : > { %v1206_v60 = vpop.permute.xlu1 %1205  ;;  %1789 = vmatpush3.msra.mxu0 %v1072_v59 }
 0x15d   : > { %1824 = vmatpush3.msra.mxu1 %v1206_v60  ;;  %1790 = vmatprep.subr.mxu0 %v1937_v4  ;;  %v1308_v60 = vstv %s1307_s10 }
 0x15e   : > { %1825 = vmatprep.subr.mxu1 %v1937_v4 }
 0x15f   : > { %v1070_v61 = vpop.permute.xlu0 %1069 }
 0x160   : > { %v1204_v23 = vpop.permute.xlu1 %1203  ;;  %1791 = vmatpush3.msra.mxu0 %v1070_v61 }
 0x161   : > { %1826 = vmatpush3.msra.mxu1 %v1204_v23  ;;  %1792 = vmatprep.subr.mxu0 %v1937_v4 }
 0x162   : > { %1827 = vmatprep.subr.mxu1 %v1937_v4 }
 0x163   : > { %v1068_v62 = vpop.permute.xlu0 %1067 }
 0x164   : > { %v1202_v63 = vpop.permute.xlu1 %1201  ;;  %1793 = vmatpush3.msra.mxu0 %v1068_v62 }
 0x165   : > { %1828 = vmatpush3.msra.mxu1 %v1202_v63  ;;  %1794 = vmatprep.subr.mxu0 %v1937_v4 }
 0x166   : > { %1829 = vmatprep.subr.mxu1 %v1937_v4 }
 0x167   : > { %v1066_v24 = vpop.permute.xlu0 %1065 }
 0x168   : > { %v1200_v15 = vpop.permute.xlu1 %1199  ;;  %1795 = vmatpush3.msra.mxu0 %v1066_v24 }
 0x169   : > { %1830 = vmatpush3.msra.mxu1 %v1200_v15  ;;  %1796 = vmatprep.subr.mxu0 %v1937_v4 }
 0x16a   : > { %1831 = vmatprep.subr.mxu1 %v1937_v4 }
 0x16b   : > { %v1064_v22 = vpop.permute.xlu0 %1063 }
 0x16c   : > { %v1198_v26 = vpop.permute.xlu1 %1197  ;;  %1797 = vmatpush3.msra.mxu0 %v1064_v22 }
 0x16d   : > { %1832 = vmatpush3.msra.mxu1 %v1198_v26  ;;  %1798 = vmatprep.subr.mxu0 %v1937_v4 }
 0x16e   : > { %1833 = vmatprep.subr.mxu1 %v1937_v4 }
 0x16f   : > { %v1062_v29 = vpop.permute.xlu0 %1061 }
 0x170   : > { %v1196_v31 = vpop.permute.xlu1 %1195  ;;  %1799 = vmatpush3.msra.mxu0 %v1062_v29 }
 0x171   : > { %1834 = vmatpush3.msra.mxu1 %v1196_v31  ;;  %1800 = vmatprep.subr.mxu0 %v1937_v4 }
 0x172   : > { %1835 = vmatprep.subr.mxu1 %v1937_v4 }
 0x173   : > { %v1060_v36 = vpop.permute.xlu0 %1059 }
 0x174   : > { %v1194_v37 = vpop.permute.xlu1 %1193  ;;  %1801 = vmatpush3.msra.mxu0 %v1060_v36 }
 0x175   : > { %1836 = vmatpush3.msra.mxu1 %v1194_v37  ;;  %1802 = vmatprep.subr.mxu0 %v1937_v4 }
 0x176   : > { %1837 = vmatprep.subr.mxu1 %v1937_v4 }
 0x177   : > { %v1058_v8 = vpop.permute.xlu0 %1057 }
 0x178   : > { %v1192_v13 = vpop.permute.xlu1 %1191  ;;  %1803 = vmatpush3.msra.mxu0 %v1058_v8 }
 0x179   : > { %1838 = vmatpush3.msra.mxu1 %v1192_v13  ;;  %1804 = vmatprep.subr.mxu0 %v1937_v4 }
 0x17a   : > { %1839 = vmatprep.subr.mxu1 %v1937_v4 }
 0x17b   : > { %v1056_v43 = vpop.permute.xlu0 %1055 }
 0x17c   : > { %v1190_v44 = vpop.permute.xlu1 %1189  ;;  %1805 = vmatpush3.msra.mxu0 %v1056_v43 }
 0x17d   : > { %1840 = vmatpush3.msra.mxu1 %v1190_v44  ;;  %1806 = vmatprep.subr.mxu0 %v1937_v4 }
 0x17e   : > { %1841 = vmatprep.subr.mxu1 %v1937_v4 }
 0x17f   : > { %v1054_v21 = vpop.permute.xlu0 %1053 }
 0x180   : > { %v1188_v46 = vpop.permute.xlu1 %1187  ;;  %1807 = vmatpush3.msra.mxu0 %v1054_v21 }
 0x181   : > { %1842 = vmatpush3.msra.mxu1 %v1188_v46  ;;  %1809 = vmatmul.mubr.f32.vlgmr.msra.gmra.mxu0 %v1052_v45 }
 0x182   : > { %1844 = vmatmul.mubr.f32.vlgmr.msra.gmra.mxu1 %v1186_v9 }
 0x186   : > { %v445_v47 = vpop.f32.mrf.mxu0 }
 0x187   : > { %v516_v4 = vadd.f32 %v2494_v19, %v445_v47 }
 0x188   : > { %v1600_v48 = vpop.f32.mrf.mxu0 }
 0x1c3   : > { %v648_v49 = vpop.f32.mrf.mxu0  ;;  %v766_v50 = vpop.f32.mrf.mxu1 }
 0x1c4   : > { %v767_v10 = vadd.f32 %v766_v50, %v648_v49 }
 0x1c5   : > { %v1670_v51 = vpop.f32.mrf.mxu0  ;;  %v1705_v52 = vpop.f32.mrf.mxu1 }
 0x201   : > { %v899_v53 = vpop.f32.mrf.mxu0 }
 0x202   : > { %v903_v56 = vadd.f32 %v899_v53, %v516_v4 }
 0x203   : > { %v1033_v54 = vpop.f32.mrf.mxu1  ;;  %v1740_v11 = vpop.f32.mrf.mxu0 }
 0x204   : > { %v1037_v57 = vadd.f32 %v1033_v54, %v767_v10 }
 0x205   : > { %v1775_v55 = vpop.f32.mrf.mxu1 }
 0x241   : > { %v1167_v12 = vpop.f32.mrf.mxu0 }
 0x242   : > { %v1171_v58 = vadd.f32 %v1167_v12, %v903_v56  ;;  %v1301_v17 = vpop.f32.mrf.mxu1 }
 0x243   : > { %v1305_v18 = vadd.f32 %v1301_v17, %v1037_v57  ;;  %v1810_v59 = vpop.f32.mrf.mxu0 }
 0x244   : > { %v1845_v61 = vpop.f32.mrf.mxu1 }
 0x245   : > { %v1306_v23 = vadd.f32 %v1305_v18, %v1171_v58 }
 0x247   : > { %v1309_v62 = vadd.f32 %v1308_v60, %v1306_v23 }
 0x249   : > { %1311 = vst.msk [vmem:[%s250_s17] sm:$0xff] %vm1310_vm1, %v1309_v62 }
 0x24a PF: > { %s18_s20 = sadd.s32 1, %s1932_s20  }
 0x24b   : > { %p15_p5 = scmp.ge.s32.totalorder %s18_s20, 4  }
 0x24d   :  { %17 = sbr.rel (!%p15_p5) target bundleno = 4 (0x4), region = 79 }
 0x252   :  { %1331 = vsyncpa [#allocation4], 1 }
 0x253   :  { %1333 = vsyncpa [#allocation4 + $0x1], 1 }
 0x254   :  { %1334 = vsyncpa [#allocation6], 1 }

</bundles_post_ra>
